<compile_context>
chip_gen: v7x
topology: tpu7x:2x2x1
jax: 0.10.0
libtpu: 0.0.40
codegen_flags: <defaults>
</compile_context>

<pallas_src>
import functools
import math

import jax
import jax.numpy as jnp
from jax.experimental import pallas as pl
from jax.experimental.pallas import tpu as pltpu


_NEG_BIG = -1e30  # finite stand-in for -inf on padded vocab lanes (exp -> 0)


def _round_up(x, m):
    return ((x + m - 1) // m) * m


def _vmem_capacity_bytes():
    """Generation-aware physical VMEM size (64 MiB v7x, 128 MiB v5e/v6e)."""
    try:
        return int(pltpu.get_tpu_info().vmem_capacity_bytes)
    except Exception:
        return 64 * 1024 * 1024  # conservative fallback (v7x size)


# --------------------------------------------------------------------------- #
# Kernels
# --------------------------------------------------------------------------- #
def _ngram_single_tile_kernel(emb_ref, w1_ref, b1_ref, w2_ref, b2_ref, out_ref):
    """Fast path: whole (padded) vocab in one shot.  grid = (row blocks,)."""
    h = jnp.dot(emb_ref[...], w1_ref[...],
                preferred_element_type=jnp.float32) + b1_ref[...]
    h = jnp.maximum(h, 0.0).astype(w2_ref.dtype)          # bf16 into the MXU
    logits = jnp.dot(h, w2_ref[...],
                     preferred_element_type=jnp.float32) + b2_ref[...]
    m = jnp.max(logits, axis=-1, keepdims=True)
    lse = m + jnp.log(jnp.sum(jnp.exp(logits - m), axis=-1, keepdims=True))
    out_ref[...] = logits - lse


def _ngram_tiled_kernel(emb_ref, w1_ref, b1_ref, w2_ref, b2_ref, out_ref,
                        h_ref, m_ref, l_ref):
    """Large-vocab path: vocab streamed in TN-wide tiles, online logsumexp.

    grid = (row blocks, vocab tiles).  The (TM, V_pad) output block stays
    resident across the vocab sweep; w2 streams through VMEM tile by tile.
    """
    j = pl.program_id(1)
    n_tiles = pl.num_programs(1)
    tn = w2_ref.shape[1]

    # first vocab tile of this row block: hidden layer (bf16 scratch) + init.
    @pl.when(j == 0)
    def _init():
        h = jnp.dot(emb_ref[...], w1_ref[...],
                    preferred_element_type=jnp.float32) + b1_ref[...]
        h_ref[...] = jnp.maximum(h, 0.0).astype(h_ref.dtype)
        m_ref[...] = jnp.full(m_ref.shape, _NEG_BIG, m_ref.dtype)
        l_ref[...] = jnp.zeros(l_ref.shape, l_ref.dtype)

    col0 = pl.multiple_of(j * tn, tn)
    logits = (jnp.dot(h_ref[...], w2_ref[...],
                      preferred_element_type=jnp.float32)
              + b2_ref[:, pl.ds(col0, tn)])

    # online logsumexp update.
    m_prev = m_ref[...]
    m_new = jnp.maximum(m_prev, jnp.max(logits, axis=-1, keepdims=True))
    l_ref[...] = (l_ref[...] * jnp.exp(m_prev - m_new)
                  + jnp.sum(jnp.exp(logits - m_new), axis=-1, keepdims=True))
    m_ref[...] = m_new

    # single lane-aligned dynamic-slice store into the resident output block.
    out_ref[:, pl.ds(col0, tn)] = logits

    # last vocab tile: normalise the whole row block in place.
    @pl.when(j == n_tiles - 1)
    def _finalize():
        lse = m_ref[...] + jnp.log(l_ref[...])
        out_ref[...] = out_ref[...] - lse


# --------------------------------------------------------------------------- #
# Wrapper
# --------------------------------------------------------------------------- #
def ngram_model_forward(x_idx, emb_table, w1, b1, w2, b2,
                        *, single_tile_max_bytes=None):
    """NgramModel forward.

    x_idx     : (context,) int32  -> returns (1, vocab)  [module semantics]
                or (B, context)   -> returns (B, vocab)  [batched]
    emb_table : (vocab, n_dim)            (bf16 or f32)
    w1        : (context*n_dim, 128), b1: (128,)
    w2        : (128, vocab),         b2: (vocab,)
    """
    x_idx = jnp.asarray(x_idx, dtype=jnp.int32)
    if x_idx.ndim == 1:
        x_idx = x_idx[None, :]
    B, context = x_idx.shape
    vocab, n_dim = emb_table.shape
    K = context * n_dim
    hidden = w1.shape[1]

    # ---- generation-aware VMEM budgets -------------------------------------
    vmem_cap = _vmem_capacity_bytes()
    vmem_limit = int(min((vmem_cap * 3) // 4, 96 * 1024 * 1024))
    w2_resident_budget = vmem_cap // 8          # 8 MiB (v7x) / 16 MiB (v5e/v6e)
    if single_tile_max_bytes is None:
        single_tile_max_bytes = w2_resident_budget

    # ---- glue: embedding gather + flatten (bf16 rows straight to the MXU) --
    # TODO(synk): fuse this gather into the kernel; with n_dim ~16 a per-row
    # DMA gather is hundreds of 32-byte copies per row block, so XLA's fused
    # gather remains the better tool at these shapes.
    emb = jnp.take(emb_table, x_idx.reshape(-1), axis=0).reshape(B, K)

    w2_itemsize = jnp.dtype(w2.dtype).itemsize
    V_pad128 = _round_up(vocab, 128)
    use_single_tile = hidden * V_pad128 * w2_itemsize <= single_tile_max_bytes

    def _nbytes(a):
        return int(a.size) * jnp.dtype(a.dtype).itemsize

    # ------------------------------------------------------------------ FAST
    if use_single_tile:
        V_pad = V_pad128
        out_budget = vmem_cap // 8
        TM = max(8, min(256, _round_up(B, 8),
                        (out_budget // (V_pad * 4)) // 8 * 8))
        if B >= 16:
            # >=2 row blocks so both v7x TensorCores get work; on 1-TC chips
            # this is just one extra (cheap) grid step.
            TM = min(TM, _round_up(-(-B // 2), 8))
        M_pad = _round_up(B, TM)
        TN = V_pad
        n_tiles = 1
    # ----------------------------------------------------------------- TILED
    else:
        # largest vocab tile with <= 12.5% extra padding over the 128-pad.
        TN, V_pad = 128, V_pad128
        for cand in (2048, 1536, 1024, 768, 512, 384, 256, 128):
            vp = _round_up(vocab, cand)
            if (vp - V_pad128) * 8 <= V_pad128 or cand == 128:
                TN, V_pad = cand, vp
                break
        n_tiles = V_pad // TN
        out_budget = vmem_cap // 4              # 16 MiB (v7x) / 32 MiB (others)
        TM = max(8, min(512, _round_up(B, 8),
                        (out_budget // (V_pad * 4)) // 8 * 8))
        M_pad = _round_up(B, TM)

    if M_pad != B:
        emb = jnp.pad(emb, ((0, M_pad - B), (0, 0)))

    b1_2d = b1.astype(jnp.float32).reshape(1, hidden)
    b2_2d = b2.astype(jnp.float32).reshape(1, vocab)
    w2_p = w2
    if V_pad != vocab:
        w2_p = jnp.pad(w2, ((0, 0), (0, V_pad - vocab)))
        # padded lanes can never win the max nor contribute to the logsumexp
        b2_2d = jnp.pad(b2_2d, ((0, 0), (0, V_pad - vocab)),
                        constant_values=_NEG_BIG)

    n_row_blocks = M_pad // TM
    w2_reads = 1 if use_single_tile else n_row_blocks
    cost = pl.CostEstimate(
        flops=int(2 * M_pad * K * hidden + 2 * M_pad * hidden * V_pad),
        transcendentals=int(M_pad * V_pad),
        bytes_accessed=int(_nbytes(emb) + _nbytes(w1) + _nbytes(b1_2d)
                           + w2_reads * (_nbytes(w2_p) + _nbytes(b2_2d))
                           + M_pad * V_pad * 4),
    )

    if use_single_tile:
        grid_spec = pltpu.PrefetchScalarGridSpec(
            num_scalar_prefetch=0,
            grid=(n_row_blocks,),
            in_specs=[
                pl.BlockSpec((TM, K), lambda i: (i, 0)),          # emb rows
                pl.BlockSpec((K, hidden), lambda i: (0, 0)),      # w1
                pl.BlockSpec((1, hidden), lambda i: (0, 0)),      # b1
                pl.BlockSpec((hidden, V_pad), lambda i: (0, 0)),  # w2 resident
                pl.BlockSpec((1, V_pad), lambda i: (0, 0)),       # b2 resident
            ],
            out_specs=pl.BlockSpec((TM, V_pad), lambda i: (i, 0)),
        )
        kernel = _ngram_single_tile_kernel
        dim_sem = ("parallel",)
    else:
        grid_spec = pltpu.PrefetchScalarGridSpec(
            num_scalar_prefetch=0,
            grid=(n_row_blocks, n_tiles),
            in_specs=[
                pl.BlockSpec((TM, K), lambda i, j: (i, 0)),        # emb rows
                pl.BlockSpec((K, hidden), lambda i, j: (0, 0)),    # w1
                pl.BlockSpec((1, hidden), lambda i, j: (0, 0)),    # b1
                pl.BlockSpec((hidden, TN), lambda i, j: (0, j)),   # w2 streamed
                pl.BlockSpec((1, V_pad), lambda i, j: (0, 0)),     # b2 resident
            ],
            out_specs=pl.BlockSpec((TM, V_pad), lambda i, j: (i, 0)),
            scratch_shapes=[
                pltpu.VMEM((TM, hidden), jnp.bfloat16),  # hidden acts (bf16)
                pltpu.VMEM((TM, 1), jnp.float32),        # running max
                pltpu.VMEM((TM, 1), jnp.float32),        # running sum-exp
            ],
        )
        kernel = _ngram_tiled_kernel
        dim_sem = ("parallel", "arbitrary")

    out = pl.pallas_call(
        kernel,
        out_shape=jax.ShapeDtypeStruct((M_pad, V_pad), jnp.float32),
        grid_spec=grid_spec,
        compiler_params=pltpu.CompilerParams(
            dimension_semantics=dim_sem,
            vmem_limit_bytes=vmem_limit,
        ),
        cost_estimate=cost,
    )(emb, w1, b1_2d, w2_p, b2_2d)

    if M_pad == B and V_pad == vocab:
        return out
    # NOTE: slicing the padding off costs an extra HBM round trip; callers that
    # can consume the padded (M_pad, V_pad) buffer should take `out` directly.
    return out[:B, :vocab]


# --------------------------------------------------------------------------- #
# Params / reference / test
# --------------------------------------------------------------------------- #
def _init_params(key, vocab, context, n_dim, hidden=128, dtype=jnp.bfloat16):
    k_emb, k_w1, k_b1, k_w2, k_b2 = jax.random.split(key, 5)
    emb_table = jax.random.normal(k_emb, (vocab, n_dim), dtype=jnp.float32)
    lim1 = 1.0 / math.sqrt(context * n_dim)
    w1 = jax.random.uniform(k_w1, (context * n_dim, hidden), minval=-lim1, maxval=lim1)
    b1 = jax.random.uniform(k_b1, (hidden,), minval=-lim1, maxval=lim1)
    lim2 = 1.0 / math.sqrt(hidden)
    w2 = jax.random.uniform(k_w2, (hidden, vocab), minval=-lim2, maxval=lim2)
    b2 = jax.random.uniform(k_b2, (vocab,), minval=-lim2, maxval=lim2)
    return (emb_table.astype(dtype), w1.astype(dtype), b1.astype(jnp.float32),
            w2.astype(dtype), b2.astype(jnp.float32))


def _reference(x_idx, emb_table, w1, b1, w2, b2):
    """Plain-JAX reference mimicking the kernel's bf16 storage / f32 accum."""
    x_idx = jnp.asarray(x_idx, dtype=jnp.int32)
    if x_idx.ndim == 1:
        x_idx = x_idx[None, :]
    B = x_idx.shape[0]
    f32 = jnp.float32
    hi = jax.lax.Precision.HIGHEST
    emb = jnp.take(emb_table.astype(f32), x_idx.reshape(-1), axis=0).reshape(B, -1)
    h = jnp.maximum(jnp.dot(emb, w1.astype(f32), precision=hi) + b1.astype(f32), 0.0)
    h = h.astype(w2.dtype).astype(f32)  # kernel feeds bf16 to the 2nd MXU matmul
    logits = jnp.dot(h, w2.astype(f32), precision=hi) + b2.astype(f32)
    return jax.nn.log_softmax(logits, axis=-1)


if __name__ == "__main__":
    key = jax.random.PRNGKey(0)
    kp_a, kp_b, kp_c, kx_a, kx_b, kx_c = jax.random.split(key, 6)

    # --- Config A: exact module semantics (single context -> (1, vocab)) ----
    vocab_a, context_a, n_dim_a = 32, 2, 16
    params_a = _init_params(kp_a, vocab_a, context_a, n_dim_a)
    x_a = jax.random.randint(kx_a, (context_a,), 0, vocab_a, dtype=jnp.int32)
    out_a = jax.block_until_ready(ngram_model_forward(x_a, *params_a))
    ref_a = _reference(x_a, *params_a)
    assert out_a.shape == (1, vocab_a)
    assert jnp.allclose(out_a, ref_a, atol=1e-3, rtol=1e-3), \
        float(jnp.max(jnp.abs(out_a - ref_a)))

    # --- Config B: batched contexts, single-vocab-tile fast path ------------
    vocab_b, context_b, n_dim_b, batch_b = 1000, 3, 16, 16
    params_b = _init_params(kp_b, vocab_b, context_b, n_dim_b)
    x_b = jax.random.randint(kx_b, (batch_b, context_b), 0, vocab_b, dtype=jnp.int32)
    out_b = jax.block_until_ready(ngram_model_forward(x_b, *params_b))
    ref_b = _reference(x_b, *params_b)
    assert out_b.shape == (batch_b, vocab_b)
    assert jnp.allclose(out_b, ref_b, atol=1e-3, rtol=1e-3), \
        float(jnp.max(jnp.abs(out_b - ref_b)))

    # --- Config C: force the tiled / online-logsumexp path (large-vocab) ----
    vocab_c, context_c, n_dim_c, batch_c = 2500, 2, 8, 4
    params_c = _init_params(kp_c, vocab_c, context_c, n_dim_c)
    x_c = jax.random.randint(kx_c, (batch_c, context_c), 0, vocab_c, dtype=jnp.int32)
    out_c = jax.block_until_ready(
        ngram_model_forward(x_c, *params_c, single_tile_max_bytes=0))
    ref_c = _reference(x_c, *params_c)
    assert out_c.shape == (batch_c, vocab_c)
    assert jnp.allclose(out_c, ref_c, atol=1e-3, rtol=1e-3), \
        float(jnp.max(jnp.abs(out_c - ref_c)))

    print("KERNEL_OK")
</pallas_src>

<mosaic_0001>
module attributes {stable_mosaic.version = 11 : i64} {
  func.func @_ngram_single_tile_kernel(%arg0: i32, %arg1: memref<8x32xbf16, #tpu.memory_space<vmem>>, %arg2: memref<32x128xbf16, #tpu.memory_space<vmem>>, %arg3: memref<1x128xf32, #tpu.memory_space<vmem>>, %arg4: memref<128x128xbf16, #tpu.memory_space<vmem>>, %arg5: memref<1x128xf32, #tpu.memory_space<vmem>>, %arg6: memref<8x128xf32, #tpu.memory_space<vmem>>) attributes {dimension_semantics = [#tpu.dimension_semantics<parallel>], iteration_bounds = array<i64: 1>, scalar_prefetch = 0 : i64, scratch_operands = 0 : i64, tpu.core_type = #tpu.core_type<tc>, window_params = [{transform_indices = @transform_0, window_bounds = array<i64: 8, 32>}, {pipeline_mode = #tpu.pipeline_mode<synchronous>, transform_indices = @transform_1, window_bounds = array<i64: 32, 128>}, {pipeline_mode = #tpu.pipeline_mode<synchronous>, transform_indices = @transform_2, window_bounds = array<i64: 1, 128>}, {pipeline_mode = #tpu.pipeline_mode<synchronous>, transform_indices = @transform_3, window_bounds = array<i64: 128, 128>}, {pipeline_mode = #tpu.pipeline_mode<synchronous>, transform_indices = @transform_4, window_bounds = array<i64: 1, 128>}, {transform_indices = @transform_5, window_bounds = array<i64: 8, 128>}]} {
    %c0 = arith.constant 0 : index
    %c0_0 = arith.constant 0 : index
    %0 = vector.load %arg1[%c0, %c0_0] : memref<8x32xbf16, #tpu.memory_space<vmem>>, vector<8x32xbf16>
    %c0_1 = arith.constant 0 : index
    %c0_2 = arith.constant 0 : index
    %1 = vector.load %arg2[%c0_1, %c0_2] : memref<32x128xbf16, #tpu.memory_space<vmem>>, vector<32x128xbf16>
    %cst = arith.constant dense<0.000000e+00> : vector<8x128xf32>
    %2 = tpu.matmul %0, %1, %cst {dimension_numbers = #tpu.dot_dimension_numbers<[1], [0], [0], [1], [0, 0, 1, 1], [], []>} : vector<8x32xbf16>, vector<32x128xbf16>, vector<8x128xf32> -> vector<8x128xf32>
    %c0_3 = arith.constant 0 : index
    %c0_4 = arith.constant 0 : index
    %3 = vector.load %arg3[%c0_3, %c0_4] : memref<1x128xf32, #tpu.memory_space<vmem>>, vector<1x128xf32>
    %4 = vector.broadcast %3 : vector<1x128xf32> to vector<8x128xf32>
    %5 = arith.addf %2, %4 : vector<8x128xf32>
    %cst_5 = arith.constant 0.000000e+00 : f32
    %6 = vector.broadcast %cst_5 : f32 to vector<8x128xf32>
    %7 = arith.maximumf %5, %6 : vector<8x128xf32>
    %8 = arith.truncf %7 : vector<8x128xf32> to vector<8x128xbf16>
    %c0_6 = arith.constant 0 : index
    %c0_7 = arith.constant 0 : index
    %9 = vector.load %arg4[%c0_6, %c0_7] : memref<128x128xbf16, #tpu.memory_space<vmem>>, vector<128x128xbf16>
    %cst_8 = arith.constant dense<0.000000e+00> : vector<8x128xf32>
    %10 = tpu.matmul %8, %9, %cst_8 {dimension_numbers = #tpu.dot_dimension_numbers<[1], [0], [0], [1], [0, 0, 1, 1], [], []>} : vector<8x128xbf16>, vector<128x128xbf16>, vector<8x128xf32> -> vector<8x128xf32>
    %c0_9 = arith.constant 0 : index
    %c0_10 = arith.constant 0 : index
    %11 = vector.load %arg5[%c0_9, %c0_10] : memref<1x128xf32, #tpu.memory_space<vmem>>, vector<1x128xf32>
    %12 = vector.broadcast %11 : vector<1x128xf32> to vector<8x128xf32>
    %13 = arith.addf %10, %12 : vector<8x128xf32>
    %cst_11 = arith.constant dense<0xFF800000> : vector<8xf32>
    %14 = vector.multi_reduction <maximumf>, %13, %cst_11 [1] : vector<8x128xf32> to vector<8xf32>
    %15 = vector.shape_cast %14 : vector<8xf32> to vector<8x1xf32>
    %16 = vector.broadcast %15 : vector<8x1xf32> to vector<8x128xf32>
    %17 = arith.subf %13, %16 : vector<8x128xf32>
    %18 = math.exp %17 : vector<8x128xf32>
    %cst_12 = arith.constant dense<0.000000e+00> : vector<8xf32>
    %19 = vector.multi_reduction <add>, %18, %cst_12 [1] : vector<8x128xf32> to vector<8xf32>
    %20 = vector.shape_cast %19 : vector<8xf32> to vector<8x1xf32>
    %21 = math.log %20 : vector<8x1xf32>
    %22 = arith.addf %15, %21 : vector<8x1xf32>
    %23 = vector.broadcast %22 : vector<8x1xf32> to vector<8x128xf32>
    %24 = arith.subf %13, %23 : vector<8x128xf32>
    %c0_13 = arith.constant 0 : index
    %c0_14 = arith.constant 0 : index
    %25 = vector.load %arg6[%c0_13, %c0_14] : memref<8x128xf32, #tpu.memory_space<vmem>>, vector<8x128xf32>
    tpu.vector_store %arg6[%c0_13, %c0_14], %24 {strides = array<i32>} : memref<8x128xf32, #tpu.memory_space<vmem>>, vector<8x128xf32>,
    return
  }
  func.func @transform_0(%arg0: i32) -> (i32, i32) {
    %c0_i32 = arith.constant 0 : i32
    %c0_i32_0 = arith.constant 0 : i32
    return %arg0, %c0_i32 : i32, i32
  }
  func.func @transform_1(%arg0: i32) -> (i32, i32) {
    %c0_i32 = arith.constant 0 : i32
    %c0_i32_0 = arith.constant 0 : i32
    %c0_i32_1 = arith.constant 0 : i32
    return %c0_i32, %c0_i32_0 : i32, i32
  }
  func.func @transform_2(%arg0: i32) -> (i32, i32) {
    %c0_i32 = arith.constant 0 : i32
    %c0_i32_0 = arith.constant 0 : i32
    %c0_i32_1 = arith.constant 0 : i32
    return %c0_i32, %c0_i32_0 : i32, i32
  }
  func.func @transform_3(%arg0: i32) -> (i32, i32) {
    %c0_i32 = arith.constant 0 : i32
    %c0_i32_0 = arith.constant 0 : i32
    %c0_i32_1 = arith.constant 0 : i32
    return %c0_i32, %c0_i32_0 : i32, i32
  }
  func.func @transform_4(%arg0: i32) -> (i32, i32) {
    %c0_i32 = arith.constant 0 : i32
    %c0_i32_0 = arith.constant 0 : i32
    %c0_i32_1 = arith.constant 0 : i32
    return %c0_i32, %c0_i32_0 : i32, i32
  }
  func.func @transform_5(%arg0: i32) -> (i32, i32) {
    %c0_i32 = arith.constant 0 : i32
    %c0_i32_0 = arith.constant 0 : i32
    return %arg0, %c0_i32 : i32, i32
  }
}

</mosaic_0001>

<bundles_post_ra>
// kernel: tpu_custom_call.1
= control target key start
LH: loop header
LB: loop body
LE: loop exit
PB: predicated region body
PF: predicated region fallthrough
CT: control target
= control target key end

     0   :  { %10 = vsyncpa [#allocation3], 0  ;;  %s537_s0 = inlined_call_operand.hbm [shape: bf16[8,32], index: 0, kind: input, shape index: {}]   ;;  %s538_s1 = inlined_call_operand.hbm [shape: bf16[32,128], index: 1, kind: input, shape index: {}]   ;;  %s539_s2 = inlined_call_operand.vmem [shape: f32[1,128], index: 2, kind: input, shape index: {}]   ;;  %s540_s3 = inlined_call_operand.hbm [shape: bf16[128,128], index: 3, kind: input, shape index: {}]   ;;  %s541_s4 = inlined_call_operand.vmem [shape: f32[1,128], index: 4, kind: input, shape index: {}]   ;;  %s542_s5 = inlined_call_operand.hbm [shape: f32[8,128], index: 5, kind: output, shape index: {}]  }
   0x1   :  { %11 = vsyncpa [#allocation6], 0 }
   0x2   :  { %12 = vsyncpa [#allocation4], 0  ;;  %s439_s18 = smov [#allocation5]   ;;  %s345_s22 = scalar_lea.hbm %s538_s1, 256 }
   0x3   :  { %s28_s19 = sshll.u32 %s439_s18, 4  ;;  %p346_p0 = scmp.ne.s32.totalorder %s538_s1, %s345_s22  ;;  %s29_s19 = int_to_ptr.vmem [resolvable:$true] %s28_s19 }
   0x4   :  { %p349_p1 = scmp.lt.u32.totalorder %s345_s22, %s538_s1 }
   0x6   :  { %p351_p2 = pnand %p349_p1, %p346_p0 }
   0x8   :  { %354 = shalt.err (!%p351_p2)
}
   0x9   :  { %s355_s27 = scalar_lea.vmem %s29_s19, 256  ;;  %p360_p4 = scmp.lt.s32.totalorder %s29_s19, %s29_s19 }
   0xa   :  { %p356_p3 = scmp.ne.s32.totalorder %s29_s19, %s355_s27  ;;  %p361_p5 = scmp.lt.s32.totalorder %s355_s27, %s355_s27 }
   0xc   :  { %p362_p6 = por %p361_p5, %p360_p4 }
   0xe   :  { %p363_p7 = pnand %p362_p6, %p356_p3 }
  0x10   :  { %366 = shalt.err (!%p363_p7)
}
  0x11   :  { %s440_s28 = smov 64   ;;  %s441_s29 = smov 4  }
  0x12   :  { %34 = dma.hbm_to_vmem [thread:$0]  %s538_s1, 256, %s29_s19, [#allocation6], %s440_s28, %s440_s28, %s441_s29  }
  0x13   :  { %s442_s7 = smov [#allocation2]   ;;  %s443_s9 = smov [#allocation7]  }
  0x14   :  { %s19_s8 = sshll.u32 %s442_s7, 4  ;;  %s42_s10 = sshll.u32 %s443_s9, 4  ;;  %s20_s8 = int_to_ptr.vmem [resolvable:$true] %s19_s8  ;;  %s43_s10 = int_to_ptr.vmem [resolvable:$true] %s42_s10 }
  0x15   :  { %s367_s13 = scalar_lea.hbm %s537_s0, 64 }
  0x16   :  { %p368_p8 = scmp.ne.s32.totalorder %s537_s0, %s367_s13  ;;  %p371_p9 = scmp.lt.u32.totalorder %s367_s13, %s537_s0 }
  0x18   :  { %p373_p10 = pnand %p371_p9, %p368_p8 }
  0x1a   :  { %376 = shalt.err (!%p373_p10)
}
  0x1b   :  { %s377_s1 = scalar_lea.vmem %s20_s8, 64  ;;  %p382_p12 = scmp.lt.s32.totalorder %s20_s8, %s20_s8 }
  0x1c   :  { %p378_p11 = scmp.ne.s32.totalorder %s20_s8, %s377_s1  ;;  %p383_p13 = scmp.lt.s32.totalorder %s377_s1, %s377_s1 }
  0x1e   :  { %p384_p0 = por %p383_p13, %p382_p12 }
  0x20   :  { %p385_p1 = pnand %p384_p0, %p378_p11 }
  0x22   :  { %388 = shalt.err (!%p385_p1)
}
  0x23   :  { %22 = dma.hbm_to_vmem [thread:$0]  %s537_s0, 64, %s20_s8, [#allocation3]  }
  0x24   :  { %s389_s22 = scalar_lea.hbm %s540_s3, 1024 }
  0x25   :  { %p390_p2 = scmp.ne.s32.totalorder %s540_s3, %s389_s22  ;;  %p393_p3 = scmp.lt.u32.totalorder %s389_s22, %s540_s3 }
  0x27   :  { %p395_p4 = pnand %p393_p3, %p390_p2 }
  0x29   :  { %398 = shalt.err (!%p395_p4)
}
  0x2a   :  { %s399_s27 = scalar_lea.vmem %s43_s10, 1024  ;;  %p404_p6 = scmp.lt.s32.totalorder %s43_s10, %s43_s10 }
  0x2b   :  { %p400_p5 = scmp.ne.s32.totalorder %s43_s10, %s399_s27  ;;  %p405_p7 = scmp.lt.s32.totalorder %s399_s27, %s399_s27 }
  0x2d   :  { %p406_p8 = por %p405_p7, %p404_p6 }
  0x2f   :  { %p407_p9 = pnand %p406_p8, %p400_p5 }
  0x31   :  { %410 = shalt.err (!%p407_p9)
}
  0x32   :  { %48 = dma.hbm_to_vmem [thread:$0]  %s540_s3, 1024, %s43_s10, [#allocation6], %s440_s28, %s440_s28, %s441_s29  }
  0x33   :  { %433 = dma.done.wait [#allocation3], 64  }
  0x34   :  { %434 = vsyncadd [#allocation3], 4294967232 }
  0x35   :  { %435 = dma.done.wait [#allocation6], 1280  }
  0x36   :  { %436 = vsyncadd [#allocation6], 4294966016  ;;  %v444_v0 = vmov 0.0   ;;  %vm445_vm0 = vmmov 0   ;;  %v331_v1 = vld [vmem:[#allocation5] sm:$0xff]   ;;  %v332_v2 = vld [vmem:[#allocation5 + $0x8] sm:$0xff]  }
  0x37   :  { %295 = vmatprep.subr.bf16.mxu0 %v444_v0  ;;  %299 = vmatprep.mubr.msk.bf16.mxu0 %vm445_vm0, %v444_v0  ;;  %v333_v3 = vld [vmem:[#allocation7] sm:$0xff]   ;;  %vm85_vm1 = vcmask 261120   ;;  %v334_v4 = vld [vmem:[#allocation7 + $0x8] sm:$0xff]   ;;  %v335_v6 = vld [vmem:[#allocation7 + $0x10] sm:$0xff]  }
  0x38   :  { %303 = vmatprep.subr.bf16.mxu1 %v444_v0  ;;  %319 = vmatprep.mubr.msk.bf16.mxu1 %vm445_vm0, %v444_v0  ;;  %v61_v5 = vld [vmem:[#allocation2] sm:$0xf]  ;;  %v336_v7 = vld [vmem:[#allocation7 + $0x18] sm:$0xff]   ;;  %v337_v8 = vld [vmem:[#allocation7 + $0x20] sm:$0xff]  }
  0x39   :  { %296 = vmatpush3.bf16.msra.mxu0 %v331_v1  ;;  %304 = vmatpush3.bf16.msra.mxu1 %v333_v3  ;;  %v338_v9 = vld [vmem:[#allocation7 + $0x28] sm:$0xff]   ;;  %v339_v10 = vld [vmem:[#allocation7 + $0x30] sm:$0xff]   ;;  %v340_v11 = vld [vmem:[#allocation7 + $0x38] sm:$0xff]  }
  0x3a   :  { %297 = vmatprep.subr.bf16.mxu0 %v444_v0  ;;  %305 = vmatprep.subr.bf16.mxu1 %v444_v0  ;;  %v270_v12 = vld [vmem:[%s539_s2] ss:$0 sm:$0xff]  ;;  %s446_s2 = smov [#allocation8]  }
  0x3b   :  { %v274_v20 = vld [vmem:[%s541_s4] ss:$0 sm:$0xff]  ;;  %s260_s7 = sshll.u32 %s446_s2, 4  ;;  %s261_s7 = int_to_ptr.vmem [resolvable:$true] %s260_s7 }
  0x3c   :  { %s411_s4 = scalar_lea.vmem %s261_s7, 128  ;;  %p416_p11 = scmp.lt.s32.totalorder %s261_s7, %s261_s7 }
  0x3d   :  { %298 = vmatpush3.bf16.msra.mxu0 %v332_v2  ;;  %306 = vmatpush3.bf16.msra.mxu1 %v334_v4  ;;  %p412_p10 = scmp.ne.s32.totalorder %s261_s7, %s411_s4  ;;  %p417_p12 = scmp.lt.s32.totalorder %s411_s4, %s411_s4 }
  0x3e   :  { %307 = vmatprep.subr.bf16.mxu1 %v444_v0 }
  0x3f   :  { %p418_p13 = por %p417_p12, %p416_p11 }
  0x40   :  { %300 = vmatmul.mubr.msk.bf16.vlgmr.msra.gmra.mrb[0].mxu0 %vm85_vm1, %v61_v5 }
  0x41   :  { %308 = vmatpush3.bf16.msra.mxu1 %v335_v6  ;;  %p419_p0 = pnand %p418_p13, %p412_p10 }
  0x42   :  { %309 = vmatprep.subr.bf16.mxu1 %v444_v0 }
  0x45   :  { %310 = vmatpush3.bf16.msra.mxu1 %v336_v7 }
  0x46   :  { %311 = vmatprep.subr.bf16.mxu1 %v444_v0 }
  0x49   :  { %312 = vmatpush3.bf16.msra.mxu1 %v337_v8 }
  0x4a   :  { %313 = vmatprep.subr.bf16.mxu1 %v444_v0 }
  0x4d   :  { %314 = vmatpush3.bf16.msra.mxu1 %v338_v9 }
  0x4e   :  { %315 = vmatprep.subr.bf16.mxu1 %v444_v0 }
  0x51   :  { %316 = vmatpush3.bf16.msra.mxu1 %v339_v10 }
  0x52   :  { %317 = vmatprep.subr.bf16.mxu1 %v444_v0 }
  0x55   :  { %318 = vmatpush3.bf16.msra.mxu1 %v340_v11 }
 0x113   :  { %v123_v13 = vpop.f32.mrb[0].mxu0 }
 0x114   :  { %v124_v14 = vadd.f32 %v270_v12, %v123_v13  ;;  %v301_v15 = vpop.f32.mrb[1].mxu0 }
 0x115   :  { %v126_v16 = vpop.f32.mrb[2].mxu0 }
 0x116   :  { %v129_v17 = vmax.f32 %v124_v14, 0.0  ;;  %v302_v18 = vpop.f32.mrb[3].mxu0 }
 0x118   :  { %v130_v19 = vpack.c.bf16 %v129_v17, %v129_v17 }
 0x11a   :  { %320 = vmatmul.mubr.bf16.vlgmr.msra.gmra.mrb[0].mxu1 %v130_v19 }
 0x1ed   :  { %v236_v21 = vpop.f32.mrb[0].mxu1 }
 0x1ee   :  { %v237_v22 = vadd.f32 %v274_v20, %v236_v21  ;;  %v321_v23 = vpop.f32.mrb[1].mxu1 }
 0x1ef   :  { %v239_v24 = vpop.f32.mrb[2].mxu1 }
 0x1f0   :  { %242 = vmax.xlane.f32.xlu0 %v237_v22  ;;  %v322_v25 = vpop.f32.mrb[3].mxu1 }
 0x27d   :  { %v243_v26 = vpop.xlane.xlu0 %242 }
 0x27e   :  { %v244_v27 = vsub.f32 %v237_v22, %v243_v26 }
 0x280   :  { %v245_v28 = vmul.f32 1.442695, %v244_v27 }
 0x282   :  { %341 = vpow2.f32 %v245_v28 }
 0x28c   :  { %v342_v29 = vpop.eup %341 }
 0x28d   :  { %247 = vadd.xlane.f32.xlu0 %v342_v29 }
 0x31a   :  { %v248_v30 = vpop.xlane.xlu0 %247 }
 0x31b   :  { %343 = vlog2.f32 %v248_v30 }
 0x325   :  { %v344_v31 = vpop.eup %343 }
 0x326   :  { %v250_v32 = vmul.f32 0.6931472, %v344_v31 }
 0x328   :  { %v251_v33 = vadd.f32 %v250_v32, %v243_v26 }
 0x32a   :  { %v252_v34 = vsub.f32 %v237_v22, %v251_v33 }
 0x32c   :  { %253 = vst [vmem:[#allocation8] sm:$0xff] %v252_v34 }
 0x32d   :  { %422 = shalt.err (!%p419_p0)
}
 0x32e   :  { %s423_s10 = scalar_lea.hbm %s542_s5, 128 }
 0x32f   :  { %p424_p1 = scmp.ne.s32.totalorder %s542_s5, %s423_s10  ;;  %p427_p2 = scmp.lt.u32.totalorder %s423_s10, %s542_s5 }
 0x331   :  { %p429_p3 = pnand %p427_p2, %p424_p1 }
 0x333   :  { %432 = shalt.err (!%p429_p3)
}
 0x334   :  { %263 = dma.vmem_to_hbm [thread:$0]  %s261_s7, 128, %s542_s5, [#allocation4]  }
 0x335   :  { %437 = dma.done.wait [#allocation4], 128  }
 0x336   :  { %438 = vsyncadd [#allocation4], 4294967168 }
 0x337   :  { %267 = vsyncpa [#allocation3], 1 }
 0x338   :  { %268 = vsyncpa [#allocation6], 1 }
 0x339   :  { %269 = vsyncpa [#allocation4], 1 }

</bundles_post_ra>
